<compile_context>
chip_gen: v6e
topology: v6e:2x2x1
jax: 0.10.0
libtpu: 0.0.40
codegen_flags: <defaults>
</compile_context>

<pallas_src>
import math

import jax
import jax.numpy as jnp
import numpy as np
from jax.experimental import pallas as pl
from jax.experimental.pallas import tpu as pltpu


def _round_up(x: int, m: int) -> int:
    return (x + m - 1) // m * m


def _erf(x):
    # Abramowitz & Stegun 7.1.26 rational approximation (max abs err ~1.5e-7,
    # i.e. at/below f32 rounding noise for this module).
    # TODO(synk): lax.erf has no guaranteed Mosaic lowering rule; this polynomial
    # stands in for the exact erf used by the PyTorch gelu.
    a1 = 0.254829592
    a2 = -0.284496736
    a3 = 1.421413741
    a4 = -1.453152027
    a5 = 1.061405429
    p = 0.3275911
    ax = jnp.abs(x)
    t = 1.0 / (1.0 + p * ax)
    poly = ((((a5 * t + a4) * t + a3) * t + a2) * t + a1) * t
    y = 1.0 - poly * jnp.exp(-ax * ax)
    return jnp.where(x >= 0, y, -y)


def _gelu_exact(x):
    # x * 0.5 * (1 + erf(x / sqrt(2)))  -- matches the module's `gelu`.
    return x * 0.5 * (1.0 + _erf(x * (1.0 / math.sqrt(2.0))))


def _lowrank_kernel(x_ref, w1_ref, b1_ref, w2_ref, b2_ref, o_ref):
    x = x_ref[...]
    # aug_dense: f32 accumulation on the MXU; bias added once per row tile.
    h = jnp.dot(x, w1_ref[...], preferred_element_type=jnp.float32) + b1_ref[...]
    h = _gelu_exact(h)                       # exact (erf) gelu in f32
    h = h.astype(x.dtype)                    # keep the second MXU pass in input dtype
    # aug_dense2: f32 accumulation; intermediate never leaves VMEM.
    out = jnp.dot(h, w2_ref[...], preferred_element_type=jnp.float32) + b2_ref[...]
    o_ref[...] = out.astype(o_ref.dtype)


def gpt2_lowrank_forward(hidden_states, w1, b1, w2, b2, *, tile_m: int = 256):
    """Fused Pallas forward of GPT2LowRank.

    hidden_states: (batch, seq, n_embd)
    w1: (n_embd_aug, n_embd)  b1: (n_embd_aug,)   -- aug_dense  (torch Linear layout)
    w2: (n_embd, n_embd_aug)  b2: (n_embd,)        -- aug_dense2
    """
    B, S, E = hidden_states.shape
    A = w1.shape[0]
    dtype = hidden_states.dtype
    M = B * S

    # Lane-dense padding of feature dims; sublane-friendly row tiling.
    Ep = _round_up(E, 128)
    Ap = _round_up(A, 128)
    tile_m = min(tile_m, _round_up(M, 8))
    Mp = _round_up(M, tile_m)

    xp = jnp.zeros((Mp, Ep), dtype).at[:M, :E].set(hidden_states.reshape(M, E))
    # Transpose weights in the wrapper so the kernel contracts on the lane axis
    # with no in-kernel transpose.
    w1t = jnp.zeros((Ep, Ap), dtype).at[:E, :A].set(w1.T.astype(dtype))
    b1p = jnp.zeros((1, Ap), jnp.float32).at[0, :A].set(b1.astype(jnp.float32))
    w2t = jnp.zeros((Ap, Ep), dtype).at[:A, :E].set(w2.T.astype(dtype))
    b2p = jnp.zeros((1, Ep), jnp.float32).at[0, :E].set(b2.astype(jnp.float32))

    grid = (Mp // tile_m,)

    out_padded = pl.pallas_call(
        _lowrank_kernel,
        out_shape=jax.ShapeDtypeStruct((Mp, Ep), dtype),
        grid_spec=pltpu.PrefetchScalarGridSpec(
            num_scalar_prefetch=0,
            grid=grid,
            in_specs=[
                pl.BlockSpec((tile_m, Ep), lambda i: (i, 0)),   # x row tile
                pl.BlockSpec((Ep, Ap), lambda i: (0, 0)),       # W1^T (resident)
                pl.BlockSpec((1, Ap), lambda i: (0, 0)),        # b1   (resident)
                pl.BlockSpec((Ap, Ep), lambda i: (0, 0)),       # W2^T (resident)
                pl.BlockSpec((1, Ep), lambda i: (0, 0)),        # b2   (resident)
            ],
            out_specs=pl.BlockSpec((tile_m, Ep), lambda i: (i, 0)),
        ),
        compiler_params=pltpu.CompilerParams(
            dimension_semantics=("parallel",),          # shards row tiles across TCs on v7x
            vmem_limit_bytes=48 * 1024 * 1024,          # safe on v5e/v6e/v7x
        ),
    )(xp, w1t, b1p, w2t, b2p)

    return out_padded[:M, :E].reshape(B, S, E)


def _reference(hidden_states, w1, b1, w2, b2):
    # Pure-JAX reference (exact erf gelu, highest-precision matmuls).
    h = jnp.dot(hidden_states, w1.T, precision=jax.lax.Precision.HIGHEST) + b1
    h = h * 0.5 * (1.0 + jax.lax.erf(h / math.sqrt(2.0)))
    return jnp.dot(h, w2.T, precision=jax.lax.Precision.HIGHEST) + b2


if __name__ == "__main__":
    key = jax.random.PRNGKey(0)
    k1, k2, k3, k4, k5 = jax.random.split(key, 5)

    batch, seq, n_embd, n_embd_aug = 2, 8, 64, 32   # small low-rank PALS config
    std = 0.02                                      # config.initializer_range

    x = jax.random.normal(k1, (batch, seq, n_embd), jnp.float32)
    w1 = std * jax.random.normal(k2, (n_embd_aug, n_embd), jnp.float32)   # aug_dense.weight
    b1 = std * jax.random.normal(k3, (n_embd_aug,), jnp.float32)          # aug_dense.bias
    w2 = std * jax.random.normal(k4, (n_embd, n_embd_aug), jnp.float32)   # aug_dense2.weight
    b2 = std * jax.random.normal(k5, (n_embd,), jnp.float32)              # aug_dense2.bias

    out = gpt2_lowrank_forward(x, w1, b1, w2, b2)
    out = jax.block_until_ready(out)

    ref = jax.block_until_ready(_reference(x, w1, b1, w2, b2))
    np.testing.assert_allclose(np.asarray(out), np.asarray(ref), rtol=2e-2, atol=1e-4)

    print("KERNEL_OK")
</pallas_src>

<mosaic_0001>
module attributes {stable_mosaic.version = 11 : i64} {
  func.func @_lowrank_kernel(%arg0: i32, %arg1: memref<16x128xf32, #tpu.memory_space<vmem>>, %arg2: memref<128x128xf32, #tpu.memory_space<vmem>>, %arg3: memref<1x128xf32, #tpu.memory_space<vmem>>, %arg4: memref<128x128xf32, #tpu.memory_space<vmem>>, %arg5: memref<1x128xf32, #tpu.memory_space<vmem>>, %arg6: memref<16x128xf32, #tpu.memory_space<vmem>>) attributes {dimension_semantics = [#tpu.dimension_semantics<parallel>], iteration_bounds = array<i64: 1>, scalar_prefetch = 0 : i64, scratch_operands = 0 : i64, tpu.core_type = #tpu.core_type<tc>, window_params = [{transform_indices = @transform_0, window_bounds = array<i64: 16, 128>}, {pipeline_mode = #tpu.pipeline_mode<synchronous>, transform_indices = @transform_1, window_bounds = array<i64: 128, 128>}, {pipeline_mode = #tpu.pipeline_mode<synchronous>, transform_indices = @transform_2, window_bounds = array<i64: 1, 128>}, {pipeline_mode = #tpu.pipeline_mode<synchronous>, transform_indices = @transform_3, window_bounds = array<i64: 128, 128>}, {pipeline_mode = #tpu.pipeline_mode<synchronous>, transform_indices = @transform_4, window_bounds = array<i64: 1, 128>}, {transform_indices = @transform_5, window_bounds = array<i64: 16, 128>}]} {
    %c0 = arith.constant 0 : index
    %c0_0 = arith.constant 0 : index
    %0 = vector.load %arg1[%c0, %c0_0] : memref<16x128xf32, #tpu.memory_space<vmem>>, vector<16x128xf32>
    %c0_1 = arith.constant 0 : index
    %c0_2 = arith.constant 0 : index
    %1 = vector.load %arg2[%c0_1, %c0_2] : memref<128x128xf32, #tpu.memory_space<vmem>>, vector<128x128xf32>
    %cst = arith.constant dense<0.000000e+00> : vector<16x128xf32>
    %2 = tpu.matmul %0, %1, %cst {dimension_numbers = #tpu.dot_dimension_numbers<[1], [0], [0], [1], [0, 0, 1, 1], [], []>} : vector<16x128xf32>, vector<128x128xf32>, vector<16x128xf32> -> vector<16x128xf32>
    %c0_3 = arith.constant 0 : index
    %c0_4 = arith.constant 0 : index
    %3 = vector.load %arg3[%c0_3, %c0_4] : memref<1x128xf32, #tpu.memory_space<vmem>>, vector<1x128xf32>
    %4 = vector.broadcast %3 : vector<1x128xf32> to vector<16x128xf32>
    %5 = arith.addf %2, %4 : vector<16x128xf32>
    %cst_5 = arith.constant 5.000000e-01 : f32
    %6 = vector.broadcast %cst_5 : f32 to vector<16x128xf32>
    %7 = arith.mulf %5, %6 : vector<16x128xf32>
    %cst_6 = arith.constant 0.707106769 : f32
    %8 = vector.broadcast %cst_6 : f32 to vector<16x128xf32>
    %9 = arith.mulf %5, %8 : vector<16x128xf32>
    %10 = math.absf %9 : vector<16x128xf32>
    %cst_7 = arith.constant 0.327591091 : f32
    %11 = vector.broadcast %cst_7 : f32 to vector<16x128xf32>
    %12 = arith.mulf %11, %10 : vector<16x128xf32>
    %cst_8 = arith.constant 1.000000e+00 : f32
    %13 = vector.broadcast %cst_8 : f32 to vector<16x128xf32>
    %14 = arith.addf %13, %12 : vector<16x128xf32>
    %cst_9 = arith.constant 1.000000e+00 : f32
    %15 = vector.broadcast %cst_9 : f32 to vector<16x128xf32>
    %16 = arith.divf %15, %14 : vector<16x128xf32>
    %cst_10 = arith.constant 1.06140542 : f32
    %17 = vector.broadcast %cst_10 : f32 to vector<16x128xf32>
    %18 = arith.mulf %17, %16 : vector<16x128xf32>
    %cst_11 = arith.constant -1.45315206 : f32
    %19 = vector.broadcast %cst_11 : f32 to vector<16x128xf32>
    %20 = arith.addf %18, %19 : vector<16x128xf32>
    %21 = arith.mulf %20, %16 : vector<16x128xf32>
    %cst_12 = arith.constant 1.42141378 : f32
    %22 = vector.broadcast %cst_12 : f32 to vector<16x128xf32>
    %23 = arith.addf %21, %22 : vector<16x128xf32>
    %24 = arith.mulf %23, %16 : vector<16x128xf32>
    %cst_13 = arith.constant -0.284496725 : f32
    %25 = vector.broadcast %cst_13 : f32 to vector<16x128xf32>
    %26 = arith.addf %24, %25 : vector<16x128xf32>
    %27 = arith.mulf %26, %16 : vector<16x128xf32>
    %cst_14 = arith.constant 0.254829586 : f32
    %28 = vector.broadcast %cst_14 : f32 to vector<16x128xf32>
    %29 = arith.addf %27, %28 : vector<16x128xf32>
    %30 = arith.mulf %29, %16 : vector<16x128xf32>
    %cst_15 = arith.constant 0.000000e+00 : f32
    %31 = vector.broadcast %cst_15 : f32 to vector<16x128xf32>
    %32 = arith.subf %31, %10 : vector<16x128xf32>
    %33 = arith.mulf %32, %10 : vector<16x128xf32>
    %34 = math.exp %33 : vector<16x128xf32>
    %35 = arith.mulf %30, %34 : vector<16x128xf32>
    %cst_16 = arith.constant 1.000000e+00 : f32
    %36 = vector.broadcast %cst_16 : f32 to vector<16x128xf32>
    %37 = arith.subf %36, %35 : vector<16x128xf32>
    %cst_17 = arith.constant 0.000000e+00 : f32
    %38 = vector.broadcast %cst_17 : f32 to vector<16x128xf32>
    %39 = arith.cmpf oge, %9, %38 : vector<16x128xf32>
    %cst_18 = arith.constant 0.000000e+00 : f32
    %40 = vector.broadcast %cst_18 : f32 to vector<16x128xf32>
    %41 = arith.subf %40, %37 : vector<16x128xf32>
    %42 = arith.select %39, %37, %41 : vector<16x128xi1>, vector<16x128xf32>
    %cst_19 = arith.constant 1.000000e+00 : f32
    %43 = vector.broadcast %cst_19 : f32 to vector<16x128xf32>
    %44 = arith.addf %43, %42 : vector<16x128xf32>
    %45 = arith.mulf %7, %44 : vector<16x128xf32>
    %c0_20 = arith.constant 0 : index
    %c0_21 = arith.constant 0 : index
    %46 = vector.load %arg4[%c0_20, %c0_21] : memref<128x128xf32, #tpu.memory_space<vmem>>, vector<128x128xf32>
    %cst_22 = arith.constant dense<0.000000e+00> : vector<16x128xf32>
    %47 = tpu.matmul %45, %46, %cst_22 {dimension_numbers = #tpu.dot_dimension_numbers<[1], [0], [0], [1], [0, 0, 1, 1], [], []>} : vector<16x128xf32>, vector<128x128xf32>, vector<16x128xf32> -> vector<16x128xf32>
    %c0_23 = arith.constant 0 : index
    %c0_24 = arith.constant 0 : index
    %48 = vector.load %arg5[%c0_23, %c0_24] : memref<1x128xf32, #tpu.memory_space<vmem>>, vector<1x128xf32>
    %49 = vector.broadcast %48 : vector<1x128xf32> to vector<16x128xf32>
    %50 = arith.addf %47, %49 : vector<16x128xf32>
    %c0_25 = arith.constant 0 : index
    %c0_26 = arith.constant 0 : index
    %51 = vector.load %arg6[%c0_25, %c0_26] : memref<16x128xf32, #tpu.memory_space<vmem>>, vector<16x128xf32>
    tpu.vector_store %arg6[%c0_25, %c0_26], %50 {strides = array<i32>} : memref<16x128xf32, #tpu.memory_space<vmem>>, vector<16x128xf32>,
    return
  }
  func.func @transform_0(%arg0: i32) -> (i32, i32) {
    %c0_i32 = arith.constant 0 : i32
    %c0_i32_0 = arith.constant 0 : i32
    return %arg0, %c0_i32 : i32, i32
  }
  func.func @transform_1(%arg0: i32) -> (i32, i32) {
    %c0_i32 = arith.constant 0 : i32
    %c0_i32_0 = arith.constant 0 : i32
    %c0_i32_1 = arith.constant 0 : i32
    return %c0_i32, %c0_i32_0 : i32, i32
  }
  func.func @transform_2(%arg0: i32) -> (i32, i32) {
    %c0_i32 = arith.constant 0 : i32
    %c0_i32_0 = arith.constant 0 : i32
    %c0_i32_1 = arith.constant 0 : i32
    return %c0_i32, %c0_i32_0 : i32, i32
  }
  func.func @transform_3(%arg0: i32) -> (i32, i32) {
    %c0_i32 = arith.constant 0 : i32
    %c0_i32_0 = arith.constant 0 : i32
    %c0_i32_1 = arith.constant 0 : i32
    return %c0_i32, %c0_i32_0 : i32, i32
  }
  func.func @transform_4(%arg0: i32) -> (i32, i32) {
    %c0_i32 = arith.constant 0 : i32
    %c0_i32_0 = arith.constant 0 : i32
    %c0_i32_1 = arith.constant 0 : i32
    return %c0_i32, %c0_i32_0 : i32, i32
  }
  func.func @transform_5(%arg0: i32) -> (i32, i32) {
    %c0_i32 = arith.constant 0 : i32
    %c0_i32_0 = arith.constant 0 : i32
    return %arg0, %c0_i32 : i32, i32
  }
}

</mosaic_0001>

<bundles_post_ra>
// kernel: tpu_custom_call.1
= control target key start
LH: loop header
LB: loop body
LE: loop exit
PB: predicated region body
PF: predicated region fallthrough
CT: control target
= control target key end

     0   :  { %10 = vsyncpa [#allocation3], 0  ;;  %s608_s0 = inlined_call_operand.hbm [shape: f32[16,128], index: 0, kind: input, shape index: {}]   ;;  %s609_s1 = inlined_call_operand.hbm [shape: f32[128,128], index: 1, kind: input, shape index: {}]   ;;  %s610_s2 = inlined_call_operand.vmem [shape: f32[1,128], index: 2, kind: input, shape index: {}]   ;;  %s611_s3 = inlined_call_operand.hbm [shape: f32[128,128], index: 3, kind: input, shape index: {}]   ;;  %s612_s4 = inlined_call_operand.vmem [shape: f32[1,128], index: 4, kind: input, shape index: {}]   ;;  %s613_s5 = inlined_call_operand.hbm [shape: f32[16,128], index: 5, kind: output, shape index: {}]  }
   0x1   :  { %11 = vsyncpa [#allocation6], 0 }
   0x2   :  { %12 = vsyncpa [#allocation4], 0  ;;  %s542_s18 = smov [#allocation5]   ;;  %s543_s20 = smov [#allocation2]  }
   0x3   :  { %s30_s19 = sshll.u32 %s542_s18, 4  ;;  %s18_s21 = sshll.u32 %s543_s20, 4  ;;  %s31_s19 = int_to_ptr.vmem [resolvable:$true] %s30_s19  ;;  %s19_s21 = int_to_ptr.vmem [resolvable:$true] %s18_s21 }
   0x4   :  { %s464_s22 = scalar_lea.vmem %s31_s19, 2048  ;;  %p469_p1 = scmp.lt.s32.totalorder %s31_s19, %s31_s19 }
   0x5   :  { %p465_p0 = scmp.ne.s32.totalorder %s31_s19, %s464_s22  ;;  %p470_p2 = scmp.lt.s32.totalorder %s464_s22, %s464_s22 }
   0x7   :  { %p471_p3 = por %p470_p2, %p469_p1 }
   0x9   :  { %p472_p4 = pnand %p471_p3, %p465_p0 }
   0xb   :  { %475 = shalt.err (!%p472_p4)
}
   0xc   :  { %s544_s23 = smov 128   ;;  %s545_s24 = smov 8  }
   0xd   :  { %36 = dma.hbm_to_vmem [thread:$0]  %s609_s1, 2048, %s31_s19, [#allocation6], %s544_s23, %s544_s23, %s545_s24  }
   0xe   :  { %s484_s27 = scalar_lea.vmem %s19_s21, 256  ;;  %p489_p6 = scmp.lt.s32.totalorder %s19_s21, %s19_s21 }
   0xf   :  { %p485_p5 = scmp.ne.s32.totalorder %s19_s21, %s484_s27  ;;  %p490_p7 = scmp.lt.s32.totalorder %s484_s27, %s484_s27 }
  0x11   :  { %p491_p8 = por %p490_p7, %p489_p6 }
  0x13   :  { %p492_p9 = pnand %p491_p8, %p485_p5 }
  0x15   :  { %495 = shalt.err (!%p492_p9)
}
  0x16   :  { %24 = dma.hbm_to_vmem [thread:$0]  %s608_s0, 256, %s19_s21, [#allocation3], %s544_s23, %s544_s23, %s545_s24  }
  0x17   :  { %s546_s30 = smov [#allocation7]  }
  0x18   :  { %s44_s6 = sshll.u32 %s546_s30, 4  ;;  %s45_s6 = int_to_ptr.vmem [resolvable:$true] %s44_s6 }
  0x19   :  { %s504_s7 = scalar_lea.vmem %s45_s6, 2048  ;;  %p509_p11 = scmp.lt.s32.totalorder %s45_s6, %s45_s6 }
  0x1a   :  { %p505_p10 = scmp.ne.s32.totalorder %s45_s6, %s504_s7  ;;  %p510_p12 = scmp.lt.s32.totalorder %s504_s7, %s504_s7 }
  0x1c   :  { %p511_p13 = por %p510_p12, %p509_p11 }
  0x1e   :  { %p512_p0 = pnand %p511_p13, %p505_p10 }
  0x20   :  { %515 = shalt.err (!%p512_p0)
}
  0x21   :  { %50 = dma.hbm_to_vmem [thread:$0]  %s611_s3, 2048, %s45_s6, [#allocation6], %s544_s23, %s544_s23, %s545_s24  }
  0x22   :  { %536 = dma.done.wait [#allocation3], 256  }
  0x23   :  { %537 = vsyncadd [#allocation3], 4294967040 }
  0x24   :  { %538 = dma.done.wait [#allocation6], 4096  }
  0x25   :  { %539 = vsyncadd [#allocation6], 4294963200  ;;  %v79_v0 = vld [vmem:[#allocation5 + $0x78] sm:$0xff]  ;;  %v78_v1 = vld [vmem:[#allocation5 + $0x70] sm:$0xff]  ;;  %s547_s10 = smov [#allocation8]  }
  0x26   :  { %372 = vmatprep.subr.mxu0 %v79_v0  ;;  %v77_v2 = vld [vmem:[#allocation5 + $0x68] sm:$0xff]  ;;  %v76_v3 = vld [vmem:[#allocation5 + $0x60] sm:$0xff]  ;;  %v62_v4 = vld [vmem:[#allocation2] sm:$0xff]  ;;  %s321_s11 = sshll.u32 %s547_s10, 4  ;;  %s322_s11 = int_to_ptr.vmem [resolvable:$true] %s321_s11 }
  0x27   :  { %373 = vmatpush3.msra.mxu0 %v79_v0  ;;  %v75_v5 = vld [vmem:[#allocation5 + $0x58] sm:$0xff]  ;;  %404 = vmatprep.mubr.f32.mxu0 %v62_v4  ;;  %v74_v6 = vld [vmem:[#allocation5 + $0x50] sm:$0xff]  ;;  %v73_v7 = vld [vmem:[#allocation5 + $0x48] sm:$0xff]  ;;  %s516_s12 = scalar_lea.vmem %s322_s11, 256  ;;  %p521_p2 = scmp.lt.s32.totalorder %s322_s11, %s322_s11 }
  0x28   :  { %374 = vmatprep.subr.mxu0 %v78_v1  ;;  %v72_v8 = vld [vmem:[#allocation5 + $0x40] sm:$0xff]  ;;  %v71_v9 = vld [vmem:[#allocation5 + $0x38] sm:$0xff]  ;;  %v70_v10 = vld [vmem:[#allocation5 + $0x30] sm:$0xff]  ;;  %p517_p1 = scmp.ne.s32.totalorder %s322_s11, %s516_s12  ;;  %p522_p3 = scmp.lt.s32.totalorder %s516_s12, %s516_s12 }
  0x29   :  { %375 = vmatpush3.msra.mxu0 %v78_v1  ;;  %v69_v11 = vld [vmem:[#allocation5 + $0x28] sm:$0xff]  ;;  %v68_v12 = vld [vmem:[#allocation5 + $0x20] sm:$0xff]  ;;  %v67_v13 = vld [vmem:[#allocation5 + $0x18] sm:$0xff] }
  0x2a   :  { %376 = vmatprep.subr.mxu0 %v77_v2  ;;  %v66_v14 = vld [vmem:[#allocation5 + $0x10] sm:$0xff]  ;;  %v65_v15 = vld [vmem:[#allocation5 + $0x8] sm:$0xff]  ;;  %v64_v16 = vld [vmem:[#allocation5] sm:$0xff]  ;;  %p523_p4 = por %p522_p3, %p521_p2 }
  0x2b   :  { %377 = vmatpush3.msra.mxu0 %v77_v2  ;;  %v63_v17 = vld [vmem:[#allocation2 + $0x8] sm:$0xff]  ;;  %v230_v19 = vld [vmem:[#allocation7 + $0x70] sm:$0xff]  ;;  %v229_v20 = vld [vmem:[#allocation7 + $0x68] sm:$0xff] }
  0x2c   :  { %378 = vmatprep.subr.mxu0 %v76_v3  ;;  %v231_v18 = vld [vmem:[#allocation7 + $0x78] sm:$0xff]  ;;  %v228_v21 = vld [vmem:[#allocation7 + $0x60] sm:$0xff]  ;;  %v226_v23 = vld [vmem:[#allocation7 + $0x50] sm:$0xff]  ;;  %p524_p5 = pnand %p523_p4, %p517_p1 }
  0x2d   :  { %379 = vmatpush3.msra.mxu0 %v76_v3  ;;  %407 = vmatprep.subr.mxu1 %v231_v18  ;;  %v227_v22 = vld [vmem:[#allocation7 + $0x58] sm:$0xff]  ;;  %v225_v24 = vld [vmem:[#allocation7 + $0x48] sm:$0xff]  ;;  %v224_v25 = vld [vmem:[#allocation7 + $0x40] sm:$0xff] }
  0x2e   :  { %380 = vmatprep.subr.mxu0 %v75_v5  ;;  %408 = vmatpush3.msra.mxu1 %v231_v18  ;;  %v223_v26 = vld [vmem:[#allocation7 + $0x38] sm:$0xff]  ;;  %v222_v27 = vld [vmem:[#allocation7 + $0x30] sm:$0xff]  ;;  %v221_v28 = vld [vmem:[#allocation7 + $0x28] sm:$0xff] }
  0x2f   :  { %381 = vmatpush3.msra.mxu0 %v75_v5  ;;  %409 = vmatprep.subr.mxu1 %v230_v19  ;;  %v220_v29 = vld [vmem:[#allocation7 + $0x20] sm:$0xff]  ;;  %v219_v30 = vld [vmem:[#allocation7 + $0x18] sm:$0xff]  ;;  %v218_v31 = vld [vmem:[#allocation7 + $0x10] sm:$0xff] }
  0x30   :  { %382 = vmatprep.subr.mxu0 %v74_v6  ;;  %410 = vmatpush3.msra.mxu1 %v230_v19  ;;  %v217_v32 = vld [vmem:[#allocation7 + $0x8] sm:$0xff]  ;;  %v216_v33 = vld [vmem:[#allocation7] sm:$0xff]  ;;  %v334_v34 = vld [vmem:[%s610_s2] ss:$0 sm:$0xff] }
  0x31   :  { %383 = vmatpush3.msra.mxu0 %v74_v6  ;;  %411 = vmatprep.subr.mxu1 %v229_v20 }
  0x32   :  { %384 = vmatprep.subr.mxu0 %v73_v7  ;;  %412 = vmatpush3.msra.mxu1 %v229_v20 }
  0x33   :  { %385 = vmatpush3.msra.mxu0 %v73_v7  ;;  %413 = vmatprep.subr.mxu1 %v228_v21 }
  0x34   :  { %386 = vmatprep.subr.mxu0 %v72_v8  ;;  %414 = vmatpush3.msra.mxu1 %v228_v21 }
  0x35   :  { %387 = vmatpush3.msra.mxu0 %v72_v8  ;;  %415 = vmatprep.subr.mxu1 %v227_v22 }
  0x36   :  { %388 = vmatprep.subr.mxu0 %v71_v9  ;;  %416 = vmatpush3.msra.mxu1 %v227_v22 }
  0x37   :  { %389 = vmatpush3.msra.mxu0 %v71_v9  ;;  %417 = vmatprep.subr.mxu1 %v226_v23 }
  0x38   :  { %390 = vmatprep.subr.mxu0 %v70_v10  ;;  %418 = vmatpush3.msra.mxu1 %v226_v23 }
  0x39   :  { %391 = vmatpush3.msra.mxu0 %v70_v10  ;;  %419 = vmatprep.subr.mxu1 %v225_v24 }
  0x3a   :  { %392 = vmatprep.subr.mxu0 %v69_v11  ;;  %420 = vmatpush3.msra.mxu1 %v225_v24 }
  0x3b   :  { %393 = vmatpush3.msra.mxu0 %v69_v11  ;;  %421 = vmatprep.subr.mxu1 %v224_v25 }
  0x3c   :  { %394 = vmatprep.subr.mxu0 %v68_v12  ;;  %422 = vmatpush3.msra.mxu1 %v224_v25  ;;  %v335_v25 = vld [vmem:[%s612_s4] ss:$0 sm:$0xff] }
  0x3d   :  { %395 = vmatpush3.msra.mxu0 %v68_v12  ;;  %423 = vmatprep.subr.mxu1 %v223_v26 }
  0x3e   :  { %396 = vmatprep.subr.mxu0 %v67_v13  ;;  %424 = vmatpush3.msra.mxu1 %v223_v26 }
  0x3f   :  { %397 = vmatpush3.msra.mxu0 %v67_v13  ;;  %425 = vmatprep.subr.mxu1 %v222_v27 }
  0x40   :  { %398 = vmatprep.subr.mxu0 %v66_v14  ;;  %426 = vmatpush3.msra.mxu1 %v222_v27 }
  0x41   :  { %399 = vmatpush3.msra.mxu0 %v66_v14  ;;  %427 = vmatprep.subr.mxu1 %v221_v28 }
  0x42   :  { %400 = vmatprep.subr.mxu0 %v65_v15  ;;  %428 = vmatpush3.msra.mxu1 %v221_v28 }
  0x43   :  { %401 = vmatpush3.msra.mxu0 %v65_v15  ;;  %429 = vmatprep.subr.mxu1 %v220_v29 }
  0x44   :  { %402 = vmatprep.subr.mxu0 %v64_v16  ;;  %430 = vmatpush3.msra.mxu1 %v220_v29 }
  0x45   :  { %403 = vmatpush3.msra.mxu0 %v64_v16  ;;  %431 = vmatprep.subr.mxu1 %v219_v30 }
  0x46   :  { %405 = vmatmul.mubr.f32.vlgmr.msra.gmra.mxu0 %v63_v17  ;;  %432 = vmatpush3.msra.mxu1 %v219_v30 }
  0x47   :  { %433 = vmatprep.subr.mxu1 %v218_v31 }
  0x48   :  { %434 = vmatpush3.msra.mxu1 %v218_v31 }
  0x49   :  { %435 = vmatprep.subr.mxu1 %v217_v32 }
  0x4a   :  { %436 = vmatpush3.msra.mxu1 %v217_v32 }
  0x4b   :  { %437 = vmatprep.subr.mxu1 %v216_v33 }
  0x4c   :  { %438 = vmatpush3.msra.mxu1 %v216_v33 }
 0x106   :  { %v406_v35 = vpop.f32.mrf.mxu0 }
 0x107   :  { %v159_v36 = vadd.f32 %v406_v35, %v334_v34 }
 0x108   :  { %v153_v37 = vpop.f32.mrf.mxu0 }
 0x109   :  { %v165_v38 = vmul.f32 0.70710677, %v159_v36  ;;  %v154_v39 = vadd.f32 %v334_v34, %v153_v37  ;;  %v163_v22 = vmul.f32 0.5, %v159_v36 }
 0x10b   :  { %v167_v40 = vand.u32 2147483647, %v165_v38  ;;  %v164_v41 = vmul.f32 0.70710677, %v154_v39  ;;  %vm207_vm0 = vcmp.ge.f32.partialorder %v165_v38, 0.0  ;;  %v162_v20 = vmul.f32 0.5, %v154_v39 }
 0x10d   :  { %v169_v42 = vmul.f32 0.3275911, %v167_v40  ;;  %v166_v43 = vand.u32 2147483647, %v164_v41  ;;  %v195_v47 = vsub.f32 0.0, %v167_v40  ;;  %vm206_vm1 = vcmp.ge.f32.partialorder %v164_v41, 0.0 }
 0x10f   :  { %v171_v44 = vadd.f32 1.0, %v169_v42  ;;  %v168_v45 = vmul.f32 0.3275911, %v166_v43  ;;  %v194_v48 = vsub.f32 0.0, %v166_v43  ;;  %v197_v49 = vmul.f32 %v195_v47, %v167_v40 }
 0x111   :  { %448 = vrcp.f32 %v171_v44  ;;  %v170_v46 = vadd.f32 1.0, %v168_v45  ;;  %v196_v51 = vmul.f32 %v194_v48, %v166_v43  ;;  %v200_v52 = vmul.f32 1.442695, %v197_v49 }
 0x113   :  { %450 = vrcp.f32 %v170_v46  ;;  %v198_v56 = vmul.f32 1.442695, %v196_v51 }
 0x114   :  { %452 = vpow2.f32 %v200_v52 }
 0x115   :  { %454 = vpow2.f32 %v198_v56 }
 0x11e   :  { %v449_v50 = vpop.eup %448 }
 0x11f   :  { %v177_v53 = vmul.f32 1.0614054, %v449_v50 }
 0x120   :  { %v451_v54 = vpop.eup %450 }
 0x121   :  { %v179_v55 = vadd.f32 -1.4531521, %v177_v53  ;;  %v176_v57 = vmul.f32 1.0614054, %v451_v54  ;;  %v453_v7 = vpop.eup %452 }
 0x122   :  { %v455_v11 = vpop.eup %454 }
 0x123   :  { %v181_v58 = vmul.f32 %v449_v50, %v179_v55  ;;  %v178_v59 = vadd.f32 -1.4531521, %v176_v57 }
 0x125   :  { %v183_v60 = vadd.f32 1.4214138, %v181_v58  ;;  %v180_v61 = vmul.f32 %v451_v54, %v178_v59 }
 0x127   :  { %v185_v62 = vmul.f32 %v449_v50, %v183_v60  ;;  %v182_v63 = vadd.f32 1.4214138, %v180_v61 }
 0x129   :  { %v187_v0 = vadd.f32 -0.28449672, %v185_v62  ;;  %v184_v1 = vmul.f32 %v451_v54, %v182_v63 }
 0x12b   :  { %v189_v2 = vmul.f32 %v449_v50, %v187_v0  ;;  %v186_v3 = vadd.f32 -0.28449672, %v184_v1 }
 0x12d   :  { %v191_v4 = vadd.f32 0.2548296, %v189_v2  ;;  %v188_v5 = vmul.f32 %v451_v54, %v186_v3 }
 0x12f   :  { %v193_v6 = vmul.f32 %v449_v50, %v191_v4  ;;  %v190_v8 = vadd.f32 0.2548296, %v188_v5 }
 0x131   :  { %v203_v9 = vmul.f32 %v453_v7, %v193_v6  ;;  %v192_v10 = vmul.f32 %v451_v54, %v190_v8 }
 0x133   :  { %v205_v12 = vsub.f32 1.0, %v203_v9  ;;  %v202_v13 = vmul.f32 %v455_v11, %v192_v10 }
 0x135   :  { %v209_v14 = vsub.f32 0.0, %v205_v12  ;;  %v204_v15 = vsub.f32 1.0, %v202_v13 }
 0x137   :  { %v211_v16 = vsel %vm207_vm0, %v205_v12, %v209_v14  ;;  %v208_v17 = vsub.f32 0.0, %v204_v15 }
 0x138   :  { %v213_v19 = vadd.f32 1.0, %v211_v16 }
 0x139   :  { %v210_v18 = vsel %vm206_vm1, %v204_v15, %v208_v17 }
 0x13a   :  { %v212_v21 = vadd.f32 1.0, %v210_v18  ;;  %v215_v24 = vmul.f32 %v213_v19, %v163_v22 }
 0x13c   :  { %v214_v23 = vmul.f32 %v212_v21, %v162_v20 }
 0x13e   :  { %439 = vmatprep.mubr.f32.mxu1 %v214_v23 }
 0x13f   :  { %440 = vmatmul.mubr.f32.vlgmr.msra.gmra.mxu1 %v215_v24 }
 0x1ff   :  { %v441_v26 = vpop.f32.mrf.mxu1 }
 0x200   :  { %v311_v27 = vadd.f32 %v441_v26, %v335_v25 }
 0x201   :  { %v305_v28 = vpop.f32.mrf.mxu1 }
 0x202   :  { %315 = vst [vmem:[#allocation8 + $0x8] sm:$0xff] %v311_v27  ;;  %v306_v29 = vadd.f32 %v335_v25, %v305_v28 }
 0x204   :  { %314 = vst [vmem:[#allocation8] sm:$0xff] %v306_v29 }
 0x205   :  { %527 = shalt.err (!%p524_p5)
}
 0x206   :  { %327 = dma.vmem_to_hbm [thread:$0]  %s322_s11, 256, %s613_s5, [#allocation4], %s544_s23, %s544_s23, %s545_s24  }
 0x207   :  { %540 = dma.done.wait [#allocation4], 256  }
 0x208   :  { %541 = vsyncadd [#allocation4], 4294967040 }
 0x209   :  { %331 = vsyncpa [#allocation3], 1 }
 0x20a   :  { %332 = vsyncpa [#allocation6], 1 }
 0x20b   :  { %333 = vsyncpa [#allocation4], 1 }

</bundles_post_ra>
